<compile_context>
chip_gen: v6e
topology: v6e:2x2x1
jax: 0.10.0
libtpu: 0.0.40
codegen_flags: <defaults>
</compile_context>

<pallas_src>
import functools

import jax
import jax.numpy as jnp
from jax.experimental import pallas as pl
from jax.experimental.pallas import tpu as pltpu

DICT_SIZE = 2
IN_CHANNELS = DICT_SIZE   # forward only valid if x has dict_size channels
OUT_CHANNELS = 4

_LANE = 128
_SUBLANE = 8
_VMEM_FOOTPRINT_BUDGET = 16 * 1024 * 1024   # double-buffered in+out cap (v7x-safe)
_VMEM_LIMIT_BYTES = 32 * 1024 * 1024        # scoped VMEM limit (raises v5e default)


# ---------------------------------------------------------------------------
# Pallas kernel: 1x1 conv as per-output-channel VPU FMAs on dense slabs
# ---------------------------------------------------------------------------
def _coef_conv1x1_kernel(w_ref, b_ref, x_ref, o_ref, *, cin, cout):
    # w_ref: [cout, cin]        (SMEM scalars)
    # b_ref: [cout]             (SMEM scalars)
    # x_ref: [nb, cin,  S, 128] (VMEM)   (or [nb, cin,  HW] fallback)
    # o_ref: [nb, cout, S, 128] (VMEM)   (or [nb, cout, HW] fallback)
    x = x_ref[...]  # one full-width load of the whole tile
    for co in range(cout):
        acc = x[:, 0] * w_ref[co, 0] + b_ref[co]
        for c in range(1, cin):
            acc = acc + x[:, c] * w_ref[co, c]
        o_ref[:, co] = acc      # dense (S,128)-per-image store, unmasked lanes


def coef_conv_1x1(x_nchw, weight, bias):
    """1x1 conv, stride 1, padding 0.  weight: [Cout, Cin, 1, 1], bias: [Cout]."""
    N, C, H, W = x_nchw.shape
    Cout = weight.shape[0]
    HW = H * W

    w2 = weight.reshape(Cout, C).astype(jnp.float32)
    b1 = bias.reshape(Cout).astype(jnp.float32)
    xf = x_nchw.astype(jnp.float32)

    kernel = functools.partial(_coef_conv1x1_kernel, cin=C, cout=Cout)
    cost = pl.CostEstimate(
        flops=2 * C * Cout * N * HW,
        transcendentals=0,
        bytes_accessed=(C + Cout) * N * HW * 4 + (Cout * C + Cout) * 4,
    )
    cparams = pltpu.CompilerParams(
        dimension_semantics=("parallel", "parallel"),
        vmem_limit_bytes=_VMEM_LIMIT_BYTES,
    )

    if HW % _LANE == 0:
        # Lane-dense layout: fold H*W into (R sublane-rows, 128 lanes). Free reshape.
        R = HW // _LANE
        x4 = xf.reshape(N, C, R, _LANE)
        row_bytes = (C + Cout) * _LANE * 4 * 2   # per row, in+out, double-buffered

        if N * R * row_bytes <= _VMEM_FOOTPRINT_BUDGET:
            # Whole problem fits comfortably: single grid step, batch folded in.
            nb, S = N, R
        else:
            # Stream: one image per step along N, big row tiles (multiple of 8),
            # partial last block handled by cdiv grid + masked edge.
            nb = 1
            S = max(_SUBLANE,
                    (_VMEM_FOOTPRINT_BUDGET // row_bytes) // _SUBLANE * _SUBLANE)
            S = min(S, R)

        grid = (pl.cdiv(N, nb), pl.cdiv(R, S))
        out4 = pl.pallas_call(
            kernel,
            out_shape=jax.ShapeDtypeStruct((N, Cout, R, _LANE), jnp.float32),
            grid=grid,
            in_specs=[
                pl.BlockSpec(memory_space=pltpu.MemorySpace.SMEM),   # weights
                pl.BlockSpec(memory_space=pltpu.MemorySpace.SMEM),   # bias
                pl.BlockSpec((nb, C, S, _LANE), lambda n, t: (n, 0, t, 0)),
            ],
            out_specs=pl.BlockSpec((nb, Cout, S, _LANE), lambda n, t: (n, 0, t, 0)),
            compiler_params=cparams,
            cost_estimate=cost,
        )(w2, b1, x4)
        return out4.reshape(N, Cout, H, W)                  # free reshape back

    # Fallback for HW not a multiple of 128: full-extent last dim (always legal).
    x3 = xf.reshape(N, C, HW)
    out3 = pl.pallas_call(
        kernel,
        out_shape=jax.ShapeDtypeStruct((N, Cout, HW), jnp.float32),
        grid=(N, 1),
        in_specs=[
            pl.BlockSpec(memory_space=pltpu.MemorySpace.SMEM),
            pl.BlockSpec(memory_space=pltpu.MemorySpace.SMEM),
            pl.BlockSpec((1, C, HW), lambda n, t: (n, 0, 0)),
        ],
        out_specs=pl.BlockSpec((1, Cout, HW), lambda n, t: (n, 0, 0)),
        compiler_params=cparams,
        cost_estimate=cost,
    )(w2, b1, x3)
    return out3.reshape(N, Cout, H, W)


# ---------------------------------------------------------------------------
# demo module forward
# ---------------------------------------------------------------------------
@jax.jit
def demo_forward(x, params):
    # PyTorch: out = dict_conv(x); print(out.shape); out = coef_conv(x)
    # dict_conv's result is discarded (only its shape is printed), so it does
    # not affect the returned tensor -> elided as dead code.
    # TODO(synk): the PyTorch `print(out.shape)` side effect is not reproduced.
    return coef_conv_1x1(x, params["coef_w"], params["coef_b"])


def init_params(key):
    k1, k2, k3, k4 = jax.random.split(key, 4)
    # dict_conv params kept for module parity (unused by the returned value)
    dict_w = jax.random.normal(k1, (DICT_SIZE, IN_CHANNELS, 3, 3), jnp.float32) * 0.1
    dict_b = jax.random.normal(k2, (DICT_SIZE,), jnp.float32) * 0.1
    coef_w = jax.random.normal(k3, (OUT_CHANNELS, DICT_SIZE, 1, 1), jnp.float32) * 0.1
    coef_b = jax.random.normal(k4, (OUT_CHANNELS,), jnp.float32) * 0.1
    return {"dict_w": dict_w, "dict_b": dict_b, "coef_w": coef_w, "coef_b": coef_b}


if __name__ == "__main__":
    key = jax.random.PRNGKey(0)
    kx, kp = jax.random.split(key)
    # x must have dict_size channels for coef_conv(x) to be valid (PyTorch quirk)
    x = jax.random.normal(kx, (2, IN_CHANNELS, 16, 16), jnp.float32)
    params = init_params(kp)

    out = demo_forward(x, params)
    out = jax.block_until_ready(out)

    # sanity: pure-JAX reference of coef_conv(x)
    ref = (
        jnp.einsum("nchw,oc->nohw", x,
                   params["coef_w"].reshape(OUT_CHANNELS, DICT_SIZE))
        + params["coef_b"][None, :, None, None]
    )
    assert out.shape == (2, OUT_CHANNELS, 16, 16)
    assert jnp.allclose(out, ref, atol=1e-5, rtol=1e-5)

    print("KERNEL_OK")
</pallas_src>

<mosaic_0001>
module attributes {stable_mosaic.version = 11 : i64} {
  func.func @_coef_conv1x1_kernel(%arg0: i32, %arg1: i32, %arg2: memref<4x2xf32, #tpu.memory_space<smem>>, %arg3: memref<4xf32, #tpu.memory_space<smem>>, %arg4: memref<2x2x2x128xf32, #tpu.memory_space<vmem>>, %arg5: memref<2x4x2x128xf32, #tpu.memory_space<vmem>>) attributes {dimension_semantics = [#tpu.dimension_semantics<parallel>, #tpu.dimension_semantics<parallel>], iteration_bounds = array<i64: 1, 1>, scalar_prefetch = 0 : i64, scratch_operands = 0 : i64, tpu.core_type = #tpu.core_type<tc>, window_params = [{transform_indices = @transform_0, window_bounds = array<i64: 4, 2>}, {transform_indices = @transform_1, window_bounds = array<i64: 4>}, {transform_indices = @transform_2, window_bounds = array<i64: 2, 2, 2, 128>}, {transform_indices = @transform_3, window_bounds = array<i64: 2, 4, 2, 128>}]} {
    %c0 = arith.constant 0 : index
    %c0_0 = arith.constant 0 : index
    %c0_1 = arith.constant 0 : index
    %c0_2 = arith.constant 0 : index
    %0 = vector.load %arg4[%c0, %c0_0, %c0_1, %c0_2] : memref<2x2x2x128xf32, #tpu.memory_space<vmem>>, vector<2x2x2x128xf32>
    %1 = vector.extract_strided_slice %0 {offsets = [0, 0, 0, 0], sizes = [2, 1, 2, 128], strides = [1, 1, 1, 1]} : vector<2x2x2x128xf32> to vector<2x1x2x128xf32>
    %2 = vector.shape_cast %1 : vector<2x1x2x128xf32> to vector<2x2x128xf32>
    %c0_3 = arith.constant 0 : index
    %c0_4 = arith.constant 0 : index
    %3 = memref.load %arg2[%c0_3, %c0_4] : memref<4x2xf32, #tpu.memory_space<smem>>
    %4 = vector.broadcast %3 : f32 to vector<2x2x128xf32>
    %5 = arith.mulf %2, %4 : vector<2x2x128xf32>
    %c0_5 = arith.constant 0 : index
    %6 = memref.load %arg3[%c0_5] : memref<4xf32, #tpu.memory_space<smem>>
    %7 = vector.broadcast %6 : f32 to vector<2x2x128xf32>
    %8 = arith.addf %5, %7 : vector<2x2x128xf32>
    %9 = vector.extract_strided_slice %0 {offsets = [0, 1, 0, 0], sizes = [2, 1, 2, 128], strides = [1, 1, 1, 1]} : vector<2x2x2x128xf32> to vector<2x1x2x128xf32>
    %10 = vector.shape_cast %9 : vector<2x1x2x128xf32> to vector<2x2x128xf32>
    %c0_6 = arith.constant 0 : index
    %c1 = arith.constant 1 : index
    %11 = memref.load %arg2[%c0_6, %c1] : memref<4x2xf32, #tpu.memory_space<smem>>
    %12 = vector.broadcast %11 : f32 to vector<2x2x128xf32>
    %13 = arith.mulf %10, %12 : vector<2x2x128xf32>
    %14 = arith.addf %8, %13 : vector<2x2x128xf32>
    %c0_7 = arith.constant 0 : index
    %c0_8 = arith.constant 0 : index
    %c0_9 = arith.constant 0 : index
    %c0_10 = arith.constant 0 : index
    %15 = vector.load %arg5[%c0_7, %c0_8, %c0_9, %c0_10] : memref<2x4x2x128xf32, #tpu.memory_space<vmem>>, vector<2x1x2x128xf32>
    %16 = vector.shape_cast %15 : vector<2x1x2x128xf32> to vector<2x2x128xf32>
    %17 = vector.shape_cast %14 : vector<2x2x128xf32> to vector<2x1x2x128xf32>
    tpu.vector_store %arg5[%c0_7, %c0_8, %c0_9, %c0_10], %17 {strides = array<i32>} : memref<2x4x2x128xf32, #tpu.memory_space<vmem>>, vector<2x1x2x128xf32>,
    %18 = vector.extract_strided_slice %0 {offsets = [0, 0, 0, 0], sizes = [2, 1, 2, 128], strides = [1, 1, 1, 1]} : vector<2x2x2x128xf32> to vector<2x1x2x128xf32>
    %19 = vector.shape_cast %18 : vector<2x1x2x128xf32> to vector<2x2x128xf32>
    %c1_11 = arith.constant 1 : index
    %c0_12 = arith.constant 0 : index
    %20 = memref.load %arg2[%c1_11, %c0_12] : memref<4x2xf32, #tpu.memory_space<smem>>
    %21 = vector.broadcast %20 : f32 to vector<2x2x128xf32>
    %22 = arith.mulf %19, %21 : vector<2x2x128xf32>
    %c1_13 = arith.constant 1 : index
    %23 = memref.load %arg3[%c1_13] : memref<4xf32, #tpu.memory_space<smem>>
    %24 = vector.broadcast %23 : f32 to vector<2x2x128xf32>
    %25 = arith.addf %22, %24 : vector<2x2x128xf32>
    %26 = vector.extract_strided_slice %0 {offsets = [0, 1, 0, 0], sizes = [2, 1, 2, 128], strides = [1, 1, 1, 1]} : vector<2x2x2x128xf32> to vector<2x1x2x128xf32>
    %27 = vector.shape_cast %26 : vector<2x1x2x128xf32> to vector<2x2x128xf32>
    %c1_14 = arith.constant 1 : index
    %c1_15 = arith.constant 1 : index
    %28 = memref.load %arg2[%c1_14, %c1_15] : memref<4x2xf32, #tpu.memory_space<smem>>
    %29 = vector.broadcast %28 : f32 to vector<2x2x128xf32>
    %30 = arith.mulf %27, %29 : vector<2x2x128xf32>
    %31 = arith.addf %25, %30 : vector<2x2x128xf32>
    %c0_16 = arith.constant 0 : index
    %c1_17 = arith.constant 1 : index
    %c0_18 = arith.constant 0 : index
    %c0_19 = arith.constant 0 : index
    %32 = vector.load %arg5[%c0_16, %c1_17, %c0_18, %c0_19] : memref<2x4x2x128xf32, #tpu.memory_space<vmem>>, vector<2x1x2x128xf32>
    %33 = vector.shape_cast %32 : vector<2x1x2x128xf32> to vector<2x2x128xf32>
    %34 = vector.shape_cast %31 : vector<2x2x128xf32> to vector<2x1x2x128xf32>
    tpu.vector_store %arg5[%c0_16, %c1_17, %c0_18, %c0_19], %34 {strides = array<i32>} : memref<2x4x2x128xf32, #tpu.memory_space<vmem>>, vector<2x1x2x128xf32>,
    %35 = vector.extract_strided_slice %0 {offsets = [0, 0, 0, 0], sizes = [2, 1, 2, 128], strides = [1, 1, 1, 1]} : vector<2x2x2x128xf32> to vector<2x1x2x128xf32>
    %36 = vector.shape_cast %35 : vector<2x1x2x128xf32> to vector<2x2x128xf32>
    %c2 = arith.constant 2 : index
    %c0_20 = arith.constant 0 : index
    %37 = memref.load %arg2[%c2, %c0_20] : memref<4x2xf32, #tpu.memory_space<smem>>
    %38 = vector.broadcast %37 : f32 to vector<2x2x128xf32>
    %39 = arith.mulf %36, %38 : vector<2x2x128xf32>
    %c2_21 = arith.constant 2 : index
    %40 = memref.load %arg3[%c2_21] : memref<4xf32, #tpu.memory_space<smem>>
    %41 = vector.broadcast %40 : f32 to vector<2x2x128xf32>
    %42 = arith.addf %39, %41 : vector<2x2x128xf32>
    %43 = vector.extract_strided_slice %0 {offsets = [0, 1, 0, 0], sizes = [2, 1, 2, 128], strides = [1, 1, 1, 1]} : vector<2x2x2x128xf32> to vector<2x1x2x128xf32>
    %44 = vector.shape_cast %43 : vector<2x1x2x128xf32> to vector<2x2x128xf32>
    %c2_22 = arith.constant 2 : index
    %c1_23 = arith.constant 1 : index
    %45 = memref.load %arg2[%c2_22, %c1_23] : memref<4x2xf32, #tpu.memory_space<smem>>
    %46 = vector.broadcast %45 : f32 to vector<2x2x128xf32>
    %47 = arith.mulf %44, %46 : vector<2x2x128xf32>
    %48 = arith.addf %42, %47 : vector<2x2x128xf32>
    %c0_24 = arith.constant 0 : index
    %c2_25 = arith.constant 2 : index
    %c0_26 = arith.constant 0 : index
    %c0_27 = arith.constant 0 : index
    %49 = vector.load %arg5[%c0_24, %c2_25, %c0_26, %c0_27] : memref<2x4x2x128xf32, #tpu.memory_space<vmem>>, vector<2x1x2x128xf32>
    %50 = vector.shape_cast %49 : vector<2x1x2x128xf32> to vector<2x2x128xf32>
    %51 = vector.shape_cast %48 : vector<2x2x128xf32> to vector<2x1x2x128xf32>
    tpu.vector_store %arg5[%c0_24, %c2_25, %c0_26, %c0_27], %51 {strides = array<i32>} : memref<2x4x2x128xf32, #tpu.memory_space<vmem>>, vector<2x1x2x128xf32>,
    %52 = vector.extract_strided_slice %0 {offsets = [0, 0, 0, 0], sizes = [2, 1, 2, 128], strides = [1, 1, 1, 1]} : vector<2x2x2x128xf32> to vector<2x1x2x128xf32>
    %53 = vector.shape_cast %52 : vector<2x1x2x128xf32> to vector<2x2x128xf32>
    %c3 = arith.constant 3 : index
    %c0_28 = arith.constant 0 : index
    %54 = memref.load %arg2[%c3, %c0_28] : memref<4x2xf32, #tpu.memory_space<smem>>
    %55 = vector.broadcast %54 : f32 to vector<2x2x128xf32>
    %56 = arith.mulf %53, %55 : vector<2x2x128xf32>
    %c3_29 = arith.constant 3 : index
    %57 = memref.load %arg3[%c3_29] : memref<4xf32, #tpu.memory_space<smem>>
    %58 = vector.broadcast %57 : f32 to vector<2x2x128xf32>
    %59 = arith.addf %56, %58 : vector<2x2x128xf32>
    %60 = vector.extract_strided_slice %0 {offsets = [0, 1, 0, 0], sizes = [2, 1, 2, 128], strides = [1, 1, 1, 1]} : vector<2x2x2x128xf32> to vector<2x1x2x128xf32>
    %61 = vector.shape_cast %60 : vector<2x1x2x128xf32> to vector<2x2x128xf32>
    %c3_30 = arith.constant 3 : index
    %c1_31 = arith.constant 1 : index
    %62 = memref.load %arg2[%c3_30, %c1_31] : memref<4x2xf32, #tpu.memory_space<smem>>
    %63 = vector.broadcast %62 : f32 to vector<2x2x128xf32>
    %64 = arith.mulf %61, %63 : vector<2x2x128xf32>
    %65 = arith.addf %59, %64 : vector<2x2x128xf32>
    %c0_32 = arith.constant 0 : index
    %c3_33 = arith.constant 3 : index
    %c0_34 = arith.constant 0 : index
    %c0_35 = arith.constant 0 : index
    %66 = vector.load %arg5[%c0_32, %c3_33, %c0_34, %c0_35] : memref<2x4x2x128xf32, #tpu.memory_space<vmem>>, vector<2x1x2x128xf32>
    %67 = vector.shape_cast %66 : vector<2x1x2x128xf32> to vector<2x2x128xf32>
    %68 = vector.shape_cast %65 : vector<2x2x128xf32> to vector<2x1x2x128xf32>
    tpu.vector_store %arg5[%c0_32, %c3_33, %c0_34, %c0_35], %68 {strides = array<i32>} : memref<2x4x2x128xf32, #tpu.memory_space<vmem>>, vector<2x1x2x128xf32>,
    return
  }
  func.func @transform_0(%arg0: i32, %arg1: i32) -> (i32, i32) {
    %c0_i32 = arith.constant 0 : i32
    %c0_i32_0 = arith.constant 0 : i32
    %c0_i32_1 = arith.constant 0 : i32
    return %c0_i32, %c0_i32_0 : i32, i32
  }
  func.func @transform_1(%arg0: i32, %arg1: i32) -> i32 {
    %c0_i32 = arith.constant 0 : i32
    %c0_i32_0 = arith.constant 0 : i32
    return %c0_i32 : i32
  }
  func.func @transform_2(%arg0: i32, %arg1: i32) -> (i32, i32, i32, i32) {
    %c0_i32 = arith.constant 0 : i32
    %c0_i32_0 = arith.constant 0 : i32
    %c0_i32_1 = arith.constant 0 : i32
    return %arg0, %c0_i32, %arg1, %c0_i32_0 : i32, i32, i32, i32
  }
  func.func @transform_3(%arg0: i32, %arg1: i32) -> (i32, i32, i32, i32) {
    %c0_i32 = arith.constant 0 : i32
    %c0_i32_0 = arith.constant 0 : i32
    %c0_i32_1 = arith.constant 0 : i32
    return %arg0, %c0_i32, %arg1, %c0_i32_0 : i32, i32, i32, i32
  }
}

</mosaic_0001>

<bundles_post_ra>
// kernel: demo_forward.1
= control target key start
LH: loop header
LB: loop body
LE: loop exit
PB: predicated region body
PF: predicated region fallthrough
CT: control target
= control target key end

     0   :  { %8 = vsyncpa [#allocation3], 0  ;;  %s241_s0 = inlined_call_operand.vmem [shape: f32[4,2], index: 0, kind: input, shape index: {}]   ;;  %s242_s1 = inlined_call_operand.vmem [shape: f32[4], index: 1, kind: input, shape index: {}]   ;;  %s243_s2 = inlined_call_operand.vmem [shape: f32[2,2,2,128], index: 2, kind: input, shape index: {}]   ;;  %s244_s3 = inlined_call_operand.vmem [shape: f32[2,4,2,128], index: 3, kind: output, shape index: {}]  }
   0x1   :  { %s16_s14 = sshll.u32 %s241_s0, 4  ;;  %s17_s14 = int_to_ptr.vmem [resolvable:$true] %s16_s14 }
   0x2   :  { %9 = vsyncpa [#allocation5], 0  ;;  %s26_s17 = sshll.u32 %s242_s1, 4  ;;  %s134_s18 = scalar_lea.vmem %s17_s14, 64  ;;  %s27_s17 = int_to_ptr.vmem [resolvable:$true] %s26_s17 }
   0x3   :  { %p135_p0 = scmp.ne.s32.totalorder %s17_s14, %s134_s18  ;;  %p139_p1 = scmp.lt.s32.totalorder %s17_s14, %s17_s14 }
   0x4   :  { %p140_p2 = scmp.lt.s32.totalorder %s134_s18, %s134_s18 }
   0x6   :  { %p141_p3 = por %p140_p2, %p139_p1 }
   0x8   :  { %p142_p4 = pnand %p141_p3, %p135_p0 }
   0xa   :  { %145 = shalt.err (!%p142_p4)
}
   0xb   :  { %s162_s19 = smov [#allocation2]   ;;  %s146_s20 = scalar_lea.vmem %s27_s17, 16 }
   0xc   :  { %19 = dma.vmem_to_smem %s17_s14, 64, %s162_s19, [#allocation3]  }
   0xd   :  { %p147_p5 = scmp.ne.s32.totalorder %s27_s17, %s146_s20  ;;  %p151_p6 = scmp.lt.s32.totalorder %s27_s17, %s27_s17 }
   0xe   :  { %p152_p7 = scmp.lt.s32.totalorder %s146_s20, %s146_s20 }
  0x10   :  { %p153_p8 = por %p152_p7, %p151_p6 }
  0x12   :  { %p154_p9 = pnand %p153_p8, %p147_p5 }
  0x14   :  { %157 = shalt.err (!%p154_p9)
}
  0x15   :  { %s163_s0 = smov [#allocation4]  }
  0x16   :  { %29 = dma.vmem_to_smem %s27_s17, 16, %s163_s0, [#allocation5]  }
  0x17   :  { %158 = dma.done.wait [#allocation3], 64  }
  0x18   :  { %159 = vsyncadd [#allocation3], 4294967232 }
  0x19   :  { %160 = dma.done.wait [#allocation5], 16  }
  0x1a   :  { %161 = vsyncadd [#allocation5], 4294967280 }
  0x1b   :  { %38 = sfence }
  0x1c   :  { %s43_s1 = sld [smem:[#allocation2]]  ;;  %v39_v0 = vld [vmem:[%s243_s2] sm:$0x3]  ;;  %v41_v1 = vld [vmem:[%s243_s2 + $0x4] sm:$0x3] }
  0x1d   :  { %s47_s21 = sld [smem:[#allocation4]]  ;;  %v40_v2 = vld [vmem:[%s243_s2 + $0x2] sm:$0x3]  ;;  %v42_v4 = vld [vmem:[%s243_s2 + $0x6] sm:$0x3] }
  0x1e   :  { %s116_s22 = sld [smem:[#allocation2 + $0x1]] }
  0x1f   :  { %s117_s23 = sld [smem:[#allocation2 + $0x80]] }
  0x20   :  { %s196_s28 = sld [smem:[#allocation4 + $0x1]] }
  0x21   :  { %s119_s29 = sld [smem:[#allocation2 + $0x81]] }
  0x22   :  { %v44_v3 = vstv %s43_s1  ;;  %s122_s7 = sld [smem:[#allocation2 + $0x100]] }
  0x23   :  { %v45_v5 = vmul.f32 %v44_v3, %v39_v0  ;;  %v48_v6 = vstv %s47_s21  ;;  %v46_v7 = vmul.f32 %v44_v3, %v41_v1  ;;  %s204_s8 = sld [smem:[#allocation4 + $0x2]] }
  0x24   :  { %v52_v8 = vstv %s116_s22  ;;  %s206_s9 = sld [smem:[#allocation2 + $0x101]] }
  0x25   :  { %v49_v9 = vadd.f32 %v48_v6, %v45_v5  ;;  %v53_v10 = vmul.f32 %v52_v8, %v40_v2  ;;  %v50_v11 = vadd.f32 %v48_v6, %v46_v7  ;;  %v54_v12 = vmul.f32 %v52_v8, %v42_v4  ;;  %s208_s10 = sld [smem:[#allocation2 + $0x180]] }
  0x26   :  { %v60_v13 = vstv %s117_s23  ;;  %v64_v14 = vstv %s196_s28  ;;  %s211_s11 = sld [smem:[#allocation4 + $0x3]] }
  0x27   :  { %v55_v15 = vadd.f32 %v53_v10, %v49_v9  ;;  %v56_v16 = vadd.f32 %v54_v12, %v50_v11  ;;  %v61_v17 = vmul.f32 %v60_v13, %v39_v0  ;;  %v68_v18 = vstv %s119_s29  ;;  %s129_s2 = sld [smem:[#allocation2 + $0x181]] }
  0x28   :  { %v69_v19 = vmul.f32 %v68_v18, %v40_v2  ;;  %v62_v20 = vmul.f32 %v60_v13, %v41_v1  ;;  %v70_v21 = vmul.f32 %v68_v18, %v42_v4  ;;  %v77_v22 = vstv %s122_s7 }
  0x29   :  { %57 = vst [vmem:[%s244_s3] sm:$0x3] %v55_v15  ;;  %58 = vst [vmem:[%s244_s3 + $0x8] sm:$0x3] %v56_v16  ;;  %v65_v23 = vadd.f32 %v64_v14, %v61_v17  ;;  %v78_v24 = vmul.f32 %v77_v22, %v39_v0  ;;  %v81_v25 = vstv %s204_s8  ;;  %v79_v26 = vmul.f32 %v77_v22, %v41_v1 }
  0x2a   :  { %v66_v27 = vadd.f32 %v64_v14, %v62_v20  ;;  %v85_v28 = vstv %s206_s9 }
  0x2b   :  { %v71_v29 = vadd.f32 %v69_v19, %v65_v23  ;;  %v82_v30 = vadd.f32 %v81_v25, %v78_v24  ;;  %v86_v31 = vmul.f32 %v85_v28, %v40_v2  ;;  %v83_v32 = vadd.f32 %v81_v25, %v79_v26 }
  0x2c   :  { %v72_v33 = vadd.f32 %v70_v21, %v66_v27  ;;  %v87_v34 = vmul.f32 %v85_v28, %v42_v4  ;;  %v94_v35 = vstv %s208_s10  ;;  %v98_v36 = vstv %s211_s11 }
  0x2d   :  { %120 = vst [vmem:[%s244_s3 + $0x2] sm:$0x3] %v71_v29  ;;  %v88_v37 = vadd.f32 %v86_v31, %v82_v30  ;;  %v95_v38 = vmul.f32 %v94_v35, %v39_v0  ;;  %v102_v39 = vstv %s129_s2  ;;  %v96_v40 = vmul.f32 %v94_v35, %v41_v1 }
  0x2e   :  { %121 = vst [vmem:[%s244_s3 + $0xa] sm:$0x3] %v72_v33  ;;  %v89_v41 = vadd.f32 %v87_v34, %v83_v32  ;;  %v103_v42 = vmul.f32 %v102_v39, %v40_v2  ;;  %v104_v43 = vmul.f32 %v102_v39, %v42_v4 }
  0x2f   :  { %125 = vst [vmem:[%s244_s3 + $0x4] sm:$0x3] %v88_v37  ;;  %v99_v44 = vadd.f32 %v98_v36, %v95_v38  ;;  %v100_v45 = vadd.f32 %v98_v36, %v96_v40 }
  0x30   :  { %126 = vst [vmem:[%s244_s3 + $0xc] sm:$0x3] %v89_v41 }
  0x31   :  { %v105_v46 = vadd.f32 %v103_v42, %v99_v44  ;;  %v106_v47 = vadd.f32 %v104_v43, %v100_v45 }
  0x33   :  { %130 = vst [vmem:[%s244_s3 + $0x6] sm:$0x3] %v105_v46  ;;  %131 = vst [vmem:[%s244_s3 + $0xe] sm:$0x3] %v106_v47 }
  0x34   :  { %114 = vsyncpa [#allocation3], 1 }
  0x35   :  { %115 = vsyncpa [#allocation5], 1 }

</bundles_post_ra>
